<compile_context>
chip_gen: v7x
topology: tpu7x:2x2x1
jax: 0.10.0
libtpu: 0.0.40
codegen_flags: <defaults>
</compile_context>

<pallas_src>
import functools

import jax
import jax.numpy as jnp
from jax import lax
from jax.experimental import pallas as pl
from jax.experimental.pallas import tpu as pltpu

_LANE = 128
_SUBLANE = 8


def _round_up(n, m):
    return ((n + m - 1) // m) * m


def _round_down(n, m):
    return (n // m) * m


def _mlp_kernel(x_ref, w1_ref, b1_ref, w2_ref, b2_ref, w3_ref, b3_ref, o_ref):
    # x_ref: (TB, F) f32 in the model's native row-major layout — no wrapper
    # cast / pad / transpose pre-pass.  Cast to bf16 in-kernel for the MXU.
    x_bf = x_ref[...].astype(jnp.bfloat16)                        # (TB, F)

    # Layer 1: contract the feature dim of BOTH operands (A @ B^T form) so
    # the result comes out feature-major / lane-dense: (64, TB).
    h1 = lax.dot_general(
        w1_ref[...], x_bf,
        dimension_numbers=(((1,), (1,)), ((), ())),
        preferred_element_type=jnp.float32)                        # (64, TB) f32
    # Bias + ReLU in f32 (v5e-friendly), then carry the activation as bf16 so
    # the dominant intermediate is half-width for the layer-2 MXU matmul.
    h1 = jnp.maximum(h1 + b1_ref[...], 0.0).astype(jnp.bfloat16)   # (64, TB)
    # dropout(p=0.2): identity in eval mode.

    # Layer 2: (32, 64) @ (64, TB) on the MXU, f32 accumulate.
    h2 = jnp.dot(w2_ref[...], h1, preferred_element_type=jnp.float32)  # (32, TB)
    h2 = jnp.maximum(h2 + b2_ref[...], 0.0)
    # dropout(p=0.2): identity in eval mode.

    # Layer 3 (32 -> 1): VPU multiply + sublane reduce -> lane-dense (1, TB)
    # row, stored with full-lane-width writes (no width-1 MXU matmul).
    z = jnp.sum(h2 * w3_ref[...], axis=0, keepdims=True) + b3_ref[...]
    o_ref[...] = jax.nn.sigmoid(z).astype(o_ref.dtype)


def _vmem_capacity_bytes():
    """Physical VMEM per TensorCore; conservative v7x fallback if query fails."""
    try:
        info = pltpu.get_tpu_info()
        for name in ("vmem_capacity_bytes", "vmem_bytes", "vmem_size_bytes"):
            val = getattr(info, name, None)
            if val:
                return int(val)
    except Exception:
        pass
    return 64 * 1024 * 1024  # v7x per-core VMEM (smallest across v5e/v6e/v7x)


def _block_vmem_bytes(tb, feat):
    """Generous upper bound on the kernel VMEM footprint for one batch tile."""
    lanes = max(_LANE, _round_up(feat, _LANE))
    x_bufs = 2 * tb * lanes * 4                         # double-buffered f32 x block (lane padded)
    out_bufs = 2 * _SUBLANE * _round_up(tb, _LANE) * 4  # double-buffered (1, TB) f32 output
    inter = tb * 1024                                   # live intermediates (h1/h2, casts)
    weights = 64 * 1024
    return x_bufs + out_bufs + inter + weights + (2 << 20)


def _choose_tile(batch, feat, block_b):
    """Pick the batch-tile size and scoped-VMEM budget for this TPU generation."""
    cap = _vmem_capacity_bytes()
    budget = int(0.85 * cap)

    # Largest 128-multiple tile whose (generously estimated) footprint fits.
    per_row = (2 * max(_LANE, _round_up(feat, _LANE)) * 4   # x double buffers
               + 2 * _SUBLANE * 4                           # out double buffers
               + 1024)                                      # intermediates
    tb_vmem = _round_down(max((budget - (8 << 20)) // per_row, _LANE), _LANE)
    tb_cap = max(min(block_b, tb_vmem), _LANE)

    if batch <= 2048:
        # Single block; all block dims equal the full array dims (no padding,
        # no divisibility constraints, overhead already negligible).
        tb = batch
    else:
        # >= 2 tiles (and preferably an even count) so the "parallel" batch
        # axis load-balances across the two v7x TensorCores; the only padding
        # is the masked ragged last block -- never a round-up to tb.
        n_min = pl.cdiv(batch, tb_cap)
        n = max(2, _round_up(n_min, 2))
        tb = min(tb_cap, _round_up(pl.cdiv(batch, n), _LANE))

    vmem_limit = max(32 << 20, _block_vmem_bytes(tb, feat) + (8 << 20))
    vmem_limit = min(vmem_limit, int(0.9 * cap))
    return tb, vmem_limit


@functools.partial(jax.jit, static_argnames=("tb", "vmem_limit"))
def _forward(x, params, *, tb, vmem_limit):
    batch, feat = x.shape
    w1, b1 = params["w1"], params["b1"]
    w2, b2 = params["w2"], params["b2"]
    w3, b3 = params["w3"], params["b3"]

    grid = (pl.cdiv(batch, tb),)   # ragged last block is masked by Pallas

    # Weights/biases: full-array blocks, constant index_map -> VMEM-resident.
    resident = lambda a: pl.BlockSpec(a.shape, lambda i: (0, 0))

    weight_bytes = sum(int(v.size) * v.dtype.itemsize
                       for v in (w1, b1, w2, b2, w3, b3))
    cost = pl.CostEstimate(
        flops=2 * batch * (feat * 64 + 64 * 32 + 32),
        transcendentals=batch,
        bytes_accessed=batch * feat * 4 + batch * 4 + weight_bytes,
    )

    out = pl.pallas_call(
        _mlp_kernel,
        out_shape=jax.ShapeDtypeStruct((1, batch), jnp.float32),
        grid=grid,
        in_specs=[
            pl.BlockSpec((tb, feat), lambda i: (i, 0)),   # x, pipelined over batch
            resident(w1), resident(b1),
            resident(w2), resident(b2),
            resident(w3), resident(b3),
        ],
        out_specs=pl.BlockSpec((1, tb), lambda i: (0, i)),  # lane-dense output row
        compiler_params=pltpu.CompilerParams(
            dimension_semantics=("parallel",),
            vmem_limit_bytes=vmem_limit,
        ),
        cost_estimate=cost,
    )(x, w1, b1, w2, b2, w3, b3)

    return out.reshape(batch, 1)                       # free reshape of (1, B)


def heart_disease_nn_forward(x, params, *, block_b=32768):
    """x: (B, input_size) float. params from init_params(). Returns (B, 1) f32."""
    batch, feat = x.shape
    tb, vmem_limit = _choose_tile(batch, feat, block_b)
    return _forward(x.astype(jnp.float32), params, tb=tb, vmem_limit=vmem_limit)


def init_params(key, input_size):
    """PyTorch-style uniform init, stored in the kernel's layout.

    w1: (64, input_size) bf16  == PyTorch layer1.weight (out, in)
    b1: (64, 1) f32            == layer1.bias[:, None]
    w2: (32, 64) bf16          == layer2.weight
    b2: (32, 1) f32
    w3: (32, 1) f32            == layer3.weight.T (column)
    b3: (1, 1) f32
    """
    ks = jax.random.split(key, 6)

    def uniform(k, shape, fan_in, dtype=jnp.float32):
        bound = 1.0 / (fan_in ** 0.5)
        return jax.random.uniform(k, shape, jnp.float32, -bound, bound).astype(dtype)

    return {
        "w1": uniform(ks[0], (64, input_size), input_size, jnp.bfloat16),
        "b1": uniform(ks[1], (64, 1), input_size),
        "w2": uniform(ks[2], (32, 64), 64, jnp.bfloat16),
        "b2": uniform(ks[3], (32, 1), 64),
        "w3": uniform(ks[4], (32, 1), 32),
        "b3": uniform(ks[5], (1, 1), 32),
    }


def reference_forward(x, params):
    """Plain-JAX reference matching the kernel's bf16 numerics."""
    xr = x.astype(jnp.bfloat16).astype(jnp.float32)
    w1 = params["w1"].astype(jnp.float32)                      # (64, F)
    w2 = params["w2"].astype(jnp.float32)                      # (32, 64)
    h = jnp.maximum(xr @ w1.T + params["b1"][:, 0], 0.0)       # (B, 64)
    h = h.astype(jnp.bfloat16).astype(jnp.float32)
    h = jnp.maximum(h @ w2.T + params["b2"][:, 0], 0.0)        # (B, 32)
    z = jnp.sum(h * params["w3"][:, 0], axis=-1, keepdims=True) + params["b3"][0]
    return jax.nn.sigmoid(z)                                   # (B, 1)


if __name__ == "__main__":
    key = jax.random.PRNGKey(0)
    k_x, k_p, k_x2 = jax.random.split(key, 3)

    input_size = 13   # classic heart-disease feature count
    params = init_params(k_p, input_size)

    # Small single-block case.
    x_small = jax.random.normal(k_x, (8, input_size), dtype=jnp.float32)
    out_small = jax.block_until_ready(heart_disease_nn_forward(x_small, params))
    ref_small = reference_forward(x_small, params)
    assert out_small.shape == (8, 1)
    assert bool(jnp.all(jnp.isfinite(out_small)))
    assert jnp.allclose(out_small, ref_small, atol=1e-3, rtol=1e-3), "mismatch (small)"

    # Multi-tile case with a ragged (masked) last block; exercises the
    # pipelined grid and the megacore-parallel batch axis.
    x_big = jax.random.normal(k_x2, (2500, input_size), dtype=jnp.float32)
    out_big = jax.block_until_ready(heart_disease_nn_forward(x_big, params))
    ref_big = reference_forward(x_big, params)
    assert out_big.shape == (2500, 1)
    assert bool(jnp.all(jnp.isfinite(out_big)))
    assert jnp.allclose(out_big, ref_big, atol=1e-3, rtol=1e-3), "mismatch (big)"

    print("KERNEL_OK")
</pallas_src>

<mosaic_0001>
module attributes {stable_mosaic.version = 11 : i64} {
  func.func @_mlp_kernel(%arg0: i32, %arg1: memref<8x13xf32, #tpu.memory_space<vmem>>, %arg2: memref<64x13xbf16, #tpu.memory_space<vmem>>, %arg3: memref<64x1xf32, #tpu.memory_space<vmem>>, %arg4: memref<32x64xbf16, #tpu.memory_space<vmem>>, %arg5: memref<32x1xf32, #tpu.memory_space<vmem>>, %arg6: memref<32x1xf32, #tpu.memory_space<vmem>>, %arg7: memref<1x1xf32, #tpu.memory_space<vmem>>, %arg8: memref<1x8xf32, #tpu.memory_space<vmem>>) attributes {dimension_semantics = [#tpu.dimension_semantics<parallel>], iteration_bounds = array<i64: 1>, scalar_prefetch = 0 : i64, scratch_operands = 0 : i64, tpu.core_type = #tpu.core_type<tc>, window_params = [{transform_indices = @transform_0, window_bounds = array<i64: 8, 13>}, {pipeline_mode = #tpu.pipeline_mode<synchronous>, transform_indices = @transform_1, window_bounds = array<i64: 64, 13>}, {pipeline_mode = #tpu.pipeline_mode<synchronous>, transform_indices = @transform_2, window_bounds = array<i64: 64, 1>}, {pipeline_mode = #tpu.pipeline_mode<synchronous>, transform_indices = @transform_3, window_bounds = array<i64: 32, 64>}, {pipeline_mode = #tpu.pipeline_mode<synchronous>, transform_indices = @transform_4, window_bounds = array<i64: 32, 1>}, {pipeline_mode = #tpu.pipeline_mode<synchronous>, transform_indices = @transform_5, window_bounds = array<i64: 32, 1>}, {pipeline_mode = #tpu.pipeline_mode<synchronous>, transform_indices = @transform_6, window_bounds = array<i64: 1, 1>}, {transform_indices = @transform_7, window_bounds = array<i64: 1, 8>}]} {
    %c0 = arith.constant 0 : index
    %c0_0 = arith.constant 0 : index
    %0 = vector.load %arg1[%c0, %c0_0] : memref<8x13xf32, #tpu.memory_space<vmem>>, vector<8x13xf32>
    %1 = arith.truncf %0 : vector<8x13xf32> to vector<8x13xbf16>
    %c0_1 = arith.constant 0 : index
    %c0_2 = arith.constant 0 : index
    %2 = vector.load %arg2[%c0_1, %c0_2] : memref<64x13xbf16, #tpu.memory_space<vmem>>, vector<64x13xbf16>
    %cst = arith.constant dense<0.000000e+00> : vector<64x8xf32>
    %3 = tpu.matmul %2, %1, %cst {dimension_numbers = #tpu.dot_dimension_numbers<[1], [1], [0], [0], [0, 0, 1, 0], [], []>} : vector<64x13xbf16>, vector<8x13xbf16>, vector<64x8xf32> -> vector<64x8xf32>
    %c0_3 = arith.constant 0 : index
    %c0_4 = arith.constant 0 : index
    %4 = vector.load %arg3[%c0_3, %c0_4] : memref<64x1xf32, #tpu.memory_space<vmem>>, vector<64x1xf32>
    %5 = vector.broadcast %4 : vector<64x1xf32> to vector<64x8xf32>
    %6 = arith.addf %3, %5 : vector<64x8xf32>
    %cst_5 = arith.constant 0.000000e+00 : f32
    %7 = vector.broadcast %cst_5 : f32 to vector<64x8xf32>
    %8 = arith.maximumf %6, %7 : vector<64x8xf32>
    %9 = arith.truncf %8 : vector<64x8xf32> to vector<64x8xbf16>
    %c0_6 = arith.constant 0 : index
    %c0_7 = arith.constant 0 : index
    %10 = vector.load %arg4[%c0_6, %c0_7] : memref<32x64xbf16, #tpu.memory_space<vmem>>, vector<32x64xbf16>
    %cst_8 = arith.constant dense<0.000000e+00> : vector<32x8xf32>
    %11 = tpu.matmul %10, %9, %cst_8 {dimension_numbers = #tpu.dot_dimension_numbers<[1], [0], [0], [1], [0, 0, 1, 1], [], []>} : vector<32x64xbf16>, vector<64x8xbf16>, vector<32x8xf32> -> vector<32x8xf32>
    %c0_9 = arith.constant 0 : index
    %c0_10 = arith.constant 0 : index
    %12 = vector.load %arg5[%c0_9, %c0_10] : memref<32x1xf32, #tpu.memory_space<vmem>>, vector<32x1xf32>
    %13 = vector.broadcast %12 : vector<32x1xf32> to vector<32x8xf32>
    %14 = arith.addf %11, %13 : vector<32x8xf32>
    %cst_11 = arith.constant 0.000000e+00 : f32
    %15 = vector.broadcast %cst_11 : f32 to vector<32x8xf32>
    %16 = arith.maximumf %14, %15 : vector<32x8xf32>
    %c0_12 = arith.constant 0 : index
    %c0_13 = arith.constant 0 : index
    %17 = vector.load %arg6[%c0_12, %c0_13] : memref<32x1xf32, #tpu.memory_space<vmem>>, vector<32x1xf32>
    %18 = vector.broadcast %17 : vector<32x1xf32> to vector<32x8xf32>
    %19 = arith.mulf %16, %18 : vector<32x8xf32>
    %cst_14 = arith.constant dense<0.000000e+00> : vector<8xf32>
    %20 = vector.multi_reduction <add>, %19, %cst_14 [0] : vector<32x8xf32> to vector<8xf32>
    %21 = vector.shape_cast %20 : vector<8xf32> to vector<1x8xf32>
    %c0_15 = arith.constant 0 : index
    %c0_16 = arith.constant 0 : index
    %22 = vector.load %arg7[%c0_15, %c0_16] : memref<1x1xf32, #tpu.memory_space<vmem>>, vector<1x1xf32>
    %23 = vector.broadcast %22 : vector<1x1xf32> to vector<1x8xf32>
    %24 = arith.addf %21, %23 : vector<1x8xf32>
    %25 = arith.negf %24 : vector<1x8xf32>
    %26 = math.exp %25 : vector<1x8xf32>
    %cst_17 = arith.constant 1.000000e+00 : f32
    %27 = vector.broadcast %cst_17 : f32 to vector<1x8xf32>
    %28 = arith.addf %27, %26 : vector<1x8xf32>
    %29 = arith.divf %27, %28 : vector<1x8xf32>
    %c0_18 = arith.constant 0 : index
    %c0_19 = arith.constant 0 : index
    %30 = vector.load %arg8[%c0_18, %c0_19] : memref<1x8xf32, #tpu.memory_space<vmem>>, vector<1x8xf32>
    tpu.vector_store %arg8[%c0_18, %c0_19], %29 {strides = array<i32>} : memref<1x8xf32, #tpu.memory_space<vmem>>, vector<1x8xf32>,
    return
  }
  func.func @transform_0(%arg0: i32) -> (i32, i32) {
    %c0_i32 = arith.constant 0 : i32
    %c0_i32_0 = arith.constant 0 : i32
    return %arg0, %c0_i32 : i32, i32
  }
  func.func @transform_1(%arg0: i32) -> (i32, i32) {
    %c0_i32 = arith.constant 0 : i32
    %c0_i32_0 = arith.constant 0 : i32
    %c0_i32_1 = arith.constant 0 : i32
    return %c0_i32, %c0_i32_0 : i32, i32
  }
  func.func @transform_2(%arg0: i32) -> (i32, i32) {
    %c0_i32 = arith.constant 0 : i32
    %c0_i32_0 = arith.constant 0 : i32
    %c0_i32_1 = arith.constant 0 : i32
    return %c0_i32, %c0_i32_0 : i32, i32
  }
  func.func @transform_3(%arg0: i32) -> (i32, i32) {
    %c0_i32 = arith.constant 0 : i32
    %c0_i32_0 = arith.constant 0 : i32
    %c0_i32_1 = arith.constant 0 : i32
    return %c0_i32, %c0_i32_0 : i32, i32
  }
  func.func @transform_4(%arg0: i32) -> (i32, i32) {
    %c0_i32 = arith.constant 0 : i32
    %c0_i32_0 = arith.constant 0 : i32
    %c0_i32_1 = arith.constant 0 : i32
    return %c0_i32, %c0_i32_0 : i32, i32
  }
  func.func @transform_5(%arg0: i32) -> (i32, i32) {
    %c0_i32 = arith.constant 0 : i32
    %c0_i32_0 = arith.constant 0 : i32
    %c0_i32_1 = arith.constant 0 : i32
    return %c0_i32, %c0_i32_0 : i32, i32
  }
  func.func @transform_6(%arg0: i32) -> (i32, i32) {
    %c0_i32 = arith.constant 0 : i32
    %c0_i32_0 = arith.constant 0 : i32
    %c0_i32_1 = arith.constant 0 : i32
    return %c0_i32, %c0_i32_0 : i32, i32
  }
  func.func @transform_7(%arg0: i32) -> (i32, i32) {
    %c0_i32 = arith.constant 0 : i32
    %c0_i32_0 = arith.constant 0 : i32
    return %c0_i32, %arg0 : i32, i32
  }
}

</mosaic_0001>

<bundles_post_ra>
// kernel: _forward.1
= control target key start
LH: loop header
LB: loop body
LE: loop exit
PB: predicated region body
PF: predicated region fallthrough
CT: control target
= control target key end

     0   :  { %s593_s0 = inlined_call_operand.vmem [shape: f32[8,13], index: 0, kind: input, shape index: {}]   ;;  %s594_s1 = inlined_call_operand.vmem [shape: bf16[64,13], index: 1, kind: input, shape index: {}]   ;;  %s595_s2 = inlined_call_operand.vmem [shape: f32[64,1], index: 2, kind: input, shape index: {}]   ;;  %s596_s3 = inlined_call_operand.vmem [shape: bf16[32,64], index: 3, kind: input, shape index: {}]   ;;  %s597_s4 = inlined_call_operand.vmem [shape: f32[32,1], index: 4, kind: input, shape index: {}]   ;;  %s598_s5 = inlined_call_operand.vmem [shape: f32[32,1], index: 5, kind: input, shape index: {}]   ;;  %s599_s6 = inlined_call_operand.<no memory space> [shape: f32[1,1], index: 6, kind: input, shape index: {}]   ;;  %s600_s7 = inlined_call_operand.hbm [shape: f32[1,8], index: 7, kind: output, shape index: {}]  }
   0x1   :  { %v12_v0 = vstv %s599_s6 }
   0x2   :  { %13 = vst [vmem:[#allocation2] sm:$0x1] %v12_v0 }
   0x3   :  { %v30_v1 = vld [vmem:[%s593_s0] sm:$0xff]  ;;  %vm108_vm0 = vcmask 105472   ;;  %v459_v4 = vmov 0   ;;  %v42_v7 = vld [vmem:[%s595_s2 + $0x10] sm:$0xff]  ;;  %v41_v8 = vld [vmem:[%s595_s2 + $0x8] sm:$0xff] }
   0x4   :  { %v31_v2 = vpack.c.bf16 %v30_v1, %v30_v1  ;;  %v425_v3 = vld [vmem:[%s594_s1] sm:$0xff]   ;;  %423 = vset.pattern.permute.xlu0 %v459_v4  ;;  %424 = vset.pattern.permute.xlu1 %v459_v4  ;;  %v426_v9 = vld [vmem:[%s594_s1 + $0x8] sm:$0xff]   ;;  %v43_v10 = vld [vmem:[%s595_s2 + $0x18] sm:$0xff] }
   0x5   :  { %400 = vmatprep.mubr.msk.bf16.mxu0 %vm108_vm0, %v425_v3  ;;  %v40_v6 = vld [vmem:[%s595_s2] sm:$0xff]  ;;  %60 = vperm.xlu1 %424, %v42_v7   ;;  %v427_v11 = vld [vmem:[%s594_s1 + $0x10] sm:$0xff]   ;;  %v45_v13 = vld [vmem:[%s595_s2 + $0x28] sm:$0xff] }
   0x6   :  { %420 = vmatprep.subr.msk.bf16.mxu0 %vm108_vm0, %v31_v2  ;;  %v122_v5 = vsel %vm108_vm0, %v31_v2, 0  ;;  %50 = vperm.xlu0 %423, %v40_v6   ;;  %v44_v12 = vld [vmem:[%s595_s2 + $0x20] sm:$0xff] }
   0x7   :  { %399 = vmatpush3.bf16.xpose.msra.mxu0 %v122_v5 }
   0x9   :  { %65 = vperm.xlu1 %424, %v43_v10  }
   0xa   :  { %55 = vperm.xlu0 %423, %v41_v8  }
   0xe   :  { %401 = vmatmul.mubr.msk.bf16.vlgmr.msra.gmra.mrb[0].mxu0 %vm108_vm0, %v426_v9 }
   0xf   :  { %14 = vsyncpa [#allocation4], 0  ;;  %404 = vmatprep.mubr.msk.bf16.mxu0 %vm108_vm0, %v427_v11  ;;  %70 = vperm.xlu0 %423, %v44_v12   ;;  %v46_v14 = vld [vmem:[%s595_s2 + $0x30] sm:$0xff]  ;;  %v428_v15 = vld [vmem:[%s594_s1 + $0x18] sm:$0xff]   ;;  %vm239_vm1 = vcmask 523264   ;;  %vm327_vm2 = vcmask 64512  }
  0x10   :  { %75 = vperm.xlu1 %424, %v45_v13   ;;  %v47_v16 = vld [vmem:[%s595_s2 + $0x38] sm:$0xff]  ;;  %v205_v17 = vld [vmem:[%s597_s4] sm:$0xff]  ;;  %v206_v18 = vld [vmem:[%s597_s4 + $0x8] sm:$0xff]  ;;  %vm358_vm3 = vcmask 57344  }
  0x11   :  { %v207_v19 = vld [vmem:[%s597_s4 + $0x10] sm:$0xff]  ;;  %v208_v20 = vld [vmem:[%s597_s4 + $0x18] sm:$0xff]  ;;  %v299_v21 = vld [vmem:[%s598_s5] sm:$0xff] }
  0x12   :  { %v300_v22 = vld [vmem:[%s598_s5 + $0x8] sm:$0xff]  ;;  %v301_v23 = vld [vmem:[%s598_s5 + $0x10] sm:$0xff]  ;;  %v302_v24 = vld [vmem:[%s598_s5 + $0x18] sm:$0xff] }
  0x13   :  { %80 = vperm.xlu0 %423, %v46_v14   ;;  %v341_v25 = vld [vmem:[#allocation2] sm:$0x1]  ;;  %v430_v63 = vld [vmem:[%s596_s3 + $0x8] sm:$0xff]  }
  0x14   :  { %85 = vperm.xlu1 %424, %v47_v16   ;;  %v429_v26 = vld [vmem:[%s596_s3] sm:$0xff]   ;;  %s460_s3 = smov [#allocation3]  }
  0x15   :  { %416 = vmatprep.mubr.msk.bf16.mxu1 %vm239_vm1, %v429_v26  ;;  %s366_s18 = sshll.u32 %s460_s3, 4  ;;  %s367_s18 = int_to_ptr.vmem [resolvable:$true] %s366_s18 }
  0x16   :  { %405 = vmatmul.mubr.msk.bf16.gmra.mrb[4].mxu0 %vm108_vm0, %v428_v15  ;;  %s435_s19 = scalar_lea.vmem %s367_s18, 16  ;;  %s439_s20 = scalar_lea.vmem %s367_s18, 32 }
  0x17   :  { %211 = vperm.xlu0 %423, %v205_v17   ;;  %p436_p0 = scmp.ne.s32.totalorder %s367_s18, %s435_s19  ;;  %p440_p1 = scmp.lt.s32.totalorder %s367_s18, %s367_s18 }
  0x18   :  { %216 = vperm.xlu1 %424, %v206_v18   ;;  %p441_p2 = scmp.lt.s32.totalorder %s439_s20, %s435_s19 }
  0x1a   :  { %p442_p3 = por %p441_p2, %p440_p1 }
  0x1b   :  { %221 = vperm.xlu0 %423, %v207_v19  }
  0x1c   :  { %226 = vperm.xlu1 %424, %v208_v20   ;;  %p443_p4 = pnand %p442_p3, %p436_p0 }
  0x1f   :  { %305 = vperm.xlu0 %423, %v299_v21  }
  0x20   :  { %310 = vperm.xlu1 %424, %v300_v22  }
  0x23   :  { %315 = vperm.xlu0 %423, %v301_v23  }
  0x24   :  { %320 = vperm.xlu1 %424, %v302_v24  }
  0x27   :  { %344 = vperm.xlu0 %423, %v341_v25  }
  0x84   :  { %v61_v28 = vpop.permute.xlu1 %60 }
  0x85   :  { %v51_v27 = vpop.permute.xlu0 %50 }
  0x88   :  { %v66_v30 = vpop.permute.xlu1 %65 }
  0x89   :  { %v56_v29 = vpop.permute.xlu0 %55 }
  0x8e   :  { %v71_v34 = vpop.permute.xlu0 %70 }
  0x8f   :  { %v76_v39 = vpop.permute.xlu1 %75 }
  0x92   :  { %v81_v46 = vpop.permute.xlu0 %80 }
  0x93   :  { %v86_v51 = vpop.permute.xlu1 %85 }
  0x96   :  { %v212_v0 = vpop.permute.xlu0 %211 }
  0x97   :  { %v217_v1 = vpop.permute.xlu1 %216 }
  0x9a   :  { %v222_v2 = vpop.permute.xlu0 %221 }
  0x9b   :  { %v227_v3 = vpop.permute.xlu1 %226 }
  0x9e   :  { %v306_v5 = vpop.permute.xlu0 %305 }
  0x9f   :  { %v311_v10 = vpop.permute.xlu1 %310 }
  0xa2   :  { %v316_v19 = vpop.permute.xlu0 %315 }
  0xa3   :  { %v321_v22 = vpop.permute.xlu1 %320 }
  0xe1   :  { %v402_v31 = vpop.f32.mrb[0].mxu0 }
  0xe2   :  { %v167_v32 = vadd.f32 %v402_v31, %v61_v28  ;;  %v158_v33 = vpop.f32.mrb[1].mxu0 }
  0xe3   :  { %v159_v35 = vadd.f32 %v158_v33, %v51_v27  ;;  %v403_v36 = vpop.f32.mrb[2].mxu0 }
  0xe4   :  { %v170_v37 = vadd.f32 %v403_v36, %v66_v30  ;;  %v161_v38 = vpop.f32.mrb[3].mxu0  ;;  %v191_v41 = vmax.f32 %v167_v32, 0.0  ;;  %v347_v30 = vlaneseq }
  0xe5   :  { %v162_v40 = vadd.f32 %v161_v38, %v56_v29  ;;  %v189_v43 = vmax.f32 %v159_v35, 0.0  ;;  %v345_v38 = vpop.permute.xlu0 %344 }
  0xe6   :  { %v192_v42 = vmax.f32 %v170_v37, 0.0  ;;  %v348_v33 = vshrl.u32 %v347_v30, 7 }
  0xe7   :  { %v190_v44 = vmax.f32 %v162_v40, 0.0 }
  0xe8   :  { %v198_v45 = vpack.c.bf16 %v192_v42, %v191_v41  ;;  %v349_v36 = vsub.s32 0, %v348_v33 }
  0xe9   :  { %v406_v47 = vpop.f32.mrb[4].mxu0  ;;  %v197_v48 = vpack.c.bf16 %v190_v44, %v189_v43 }
  0xea   :  { %v183_v49 = vadd.f32 %v406_v47, %v81_v46  ;;  %v174_v50 = vpop.f32.mrb[5].mxu0  ;;  %v350_v40 = vrot.slane %v345_v38, %v349_v36 }
  0xeb   :  { %v175_v52 = vadd.f32 %v174_v50, %v71_v34  ;;  %v407_v53 = vpop.f32.mrb[6].mxu0  ;;  %408 = vmatprep.subr.bf16.mxu1 %v197_v48 }
  0xec   :  { %v186_v54 = vadd.f32 %v407_v53, %v86_v51  ;;  %v177_v55 = vpop.f32.mrb[7].mxu0  ;;  %409 = vmatpush3.bf16.msra.mxu1 %v197_v48  ;;  %v195_v57 = vmax.f32 %v183_v49, 0.0 }
  0xed   :  { %v178_v56 = vadd.f32 %v177_v55, %v76_v39  ;;  %410 = vmatprep.subr.bf16.mxu1 %v198_v45  ;;  %v193_v59 = vmax.f32 %v175_v52, 0.0 }
  0xee   :  { %v196_v58 = vmax.f32 %v186_v54, 0.0 }
  0xef   :  { %v194_v60 = vmax.f32 %v178_v56, 0.0 }
  0xf0   :  { %v200_v61 = vpack.c.bf16 %v196_v58, %v195_v57  ;;  %411 = vmatpush3.bf16.msra.mxu1 %v198_v45 }
  0xf1   :  { %v199_v62 = vpack.c.bf16 %v194_v60, %v193_v59 }
  0xf3   :  { %412 = vmatprep.subr.bf16.mxu1 %v199_v62 }
  0xf4   :  { %413 = vmatpush3.bf16.msra.mxu1 %v199_v62 }
  0xf5   :  { %414 = vmatprep.subr.bf16.mxu1 %v200_v61 }
  0xf8   :  { %415 = vmatpush3.bf16.msra.mxu1 %v200_v61 }
  0xfb   :  { %417 = vmatmul.mubr.msk.bf16.vlgmr.msra.gmra.mrb[0].mxu1 %vm239_vm1, %v430_v63 }
 0x1ce   :  { %v418_v4 = vpop.f32.mrb[0].mxu1 }
 0x1cf   :  { %v289_v6 = vadd.f32 %v418_v4, %v222_v2  ;;  %v280_v7 = vpop.f32.mrb[1].mxu1 }
 0x1d0   :  { %v281_v8 = vadd.f32 %v280_v7, %v212_v0  ;;  %v419_v9 = vpop.f32.mrb[2].mxu1 }
 0x1d1   :  { %v292_v11 = vadd.f32 %v419_v9, %v227_v3  ;;  %v283_v12 = vpop.f32.mrb[3].mxu1  ;;  %v297_v13 = vmax.f32 %v289_v6, 0.0 }
 0x1d2   :  { %v295_v14 = vmax.f32 %v281_v8, 0.0  ;;  %v284_v15 = vadd.f32 %v283_v12, %v217_v1 }
 0x1d3   :  { %v298_v17 = vmax.f32 %v292_v11, 0.0  ;;  %v325_v20 = vmul.f32 %v316_v19, %v297_v13 }
 0x1d4   :  { %v323_v16 = vmul.f32 %v306_v5, %v295_v14  ;;  %v296_v18 = vmax.f32 %v284_v15, 0.0 }
 0x1d5   :  { %v326_v24 = vmul.f32 %v321_v22, %v298_v17  ;;  %v331_v27 = vsel %vm327_vm2, %v325_v20, 0.0 }
 0x1d6   :  { %v324_v21 = vmul.f32 %v311_v10, %v296_v18  ;;  %v328_v23 = vsel %vm327_vm2, %v323_v16, 0.0 }
 0x1d7   :  { %v333_v29 = vsel %vm327_vm2, %v326_v24, 0.0 }
 0x1d8   :  { %v329_v25 = vsel %vm327_vm2, %v324_v21, 0.0 }
 0x1d9   :  { %v330_v26 = vadd.f32 %v329_v25, %v328_v23 }
 0x1db   :  { %v332_v28 = vadd.f32 %v331_v27, %v330_v26 }
 0x1dd   :  { %v334_v31 = vadd.f32 %v333_v29, %v332_v28 }
 0x1df   :  { %v335_v32 = vrot.slane %v334_v31, 4 }
 0x1e1   :  { %v336_v34 = vadd.f32 %v335_v32, %v334_v31 }
 0x1e3   :  { %v337_v35 = vrot.slane %v336_v34, 2 }
 0x1e5   :  { %v338_v37 = vadd.f32 %v337_v35, %v336_v34 }
 0x1e7   :  { %v339_v39 = vrot.slane %v338_v37, 1 }
 0x1e9   :  { %v340_v41 = vadd.f32 %v339_v39, %v338_v37 }
 0x1eb   :  { %v351_v42 = vadd.f32 %v350_v40, %v340_v41 }
 0x1ed   :  { %v386_v43 = vmul.f32 -1.442695, %v351_v42 }
 0x1ef   :  { %431 = vpow2.f32 %v386_v43 }
 0x1f9   :  { %v432_v44 = vpop.eup %431 }
 0x1fa   :  { %v355_v45 = vadd.f32 1.0, %v432_v44 }
 0x1fc   :  { %433 = vrcp.f32 %v355_v45 }
 0x206   :  { %v434_v46 = vpop.eup %433 }
 0x207   :  { %359 = vst.msk [vmem:[#allocation3] sm:$0x1] %vm358_vm3, %v434_v46 }
 0x208   :  { %446 = shalt.err (!%p443_p4)
}
 0x209   :  { %s447_s23 = scalar_lea.hbm %s600_s7, 16 }
 0x20a   :  { %p448_p5 = scmp.ne.s32.totalorder %s600_s7, %s447_s23  ;;  %p451_p6 = scmp.lt.u32.totalorder %s447_s23, %s600_s7 }
 0x20c   :  { %p453_p7 = pnand %p451_p6, %p448_p5 }
 0x20e   :  { %456 = shalt.err (!%p453_p7)
}
 0x20f   :  { %369 = dma.vmem_to_hbm [thread:$0]  %s367_s18, 16, %s600_s7, [#allocation4]  }
 0x210   :  { %457 = dma.done.wait [#allocation4], 16  }
 0x211   :  { %458 = vsyncadd [#allocation4], 4294967280 }
 0x212   :  { %373 = vsyncpa [#allocation4], 1 }

</bundles_post_ra>
